<compile_context>
chip_gen: v6e
topology: v6e:2x2x1
jax: 0.10.0
libtpu: 0.0.40
codegen_flags: <defaults>
</compile_context>

<pallas_src>
import functools
import math

import jax
import jax.numpy as jnp
from jax import lax
from jax.experimental import pallas as pl
from jax.experimental.pallas import tpu as pltpu


# ---------------------------------------------------------------------------
# Fused kernel.
# Grid: (V // v_tile,) over vocab tiles ("arbitrary": h lives in scratch).
#
# Step 0 (prologue, pl.when):
#   enc    = relu(src @ W_enc + b_enc)                         (B*S, D)
#   scores = (tgt . enc^T) * scale + bias                      (B*T, B*S)
#   attn   = softmax(scores)                                   (B*T, B*S)
#   h      = tgt + attn @ enc          -> bf16 scratch         (B*T, D)
#   pooled = (pool_mask @ enc) / max(len, 1)                   (B, D)
#   head   = pooled @ W_head + b_head  (packed [proj | bin | 0])
#   head[:, :Dp] L2-normalized in place -> head_out            (B, 128)
#
# Every step:
#   logits[:, vtile] = h @ W_out[:, vtile] + b_out[:, vtile]   (B*T, TV)
# ---------------------------------------------------------------------------
def _fused_kernel(src_ref, tgt_ref, bias_ref, pmask_ref,
                  w_enc_ref, b_enc_ref, w_head_ref, b_head_ref,
                  w_out_ref, b_out_ref,
                  logits_ref, head_ref,
                  h_scratch,
                  *, d_proj, scale):
    vj = pl.program_id(0)

    @pl.when(vj == 0)
    def _prologue():
        src = src_ref[...]                                      # (BS, D) bf16
        tgt = tgt_ref[...]                                      # (BT, D) bf16

        # encoder MLP (bf16 x bf16 -> f32 accumulate)
        enc = jnp.dot(src, w_enc_ref[...],
                      preferred_element_type=jnp.float32)
        enc = jnp.maximum(enc + b_enc_ref[...], 0.0)            # (BS, D) f32
        enc_b = enc.astype(jnp.bfloat16)

        # cross attention: contract last dims (no explicit enc.T)
        scores = lax.dot_general(
            tgt, enc_b, (((1,), (1,)), ((), ())),
            preferred_element_type=jnp.float32)                 # (BT, BS) f32
        scores = scores * scale + bias_ref[...]                 # block-diag + len mask
        m = jnp.max(scores, axis=-1, keepdims=True)
        p = jnp.exp(scores - m)
        denom = jnp.sum(p, axis=-1, keepdims=True)
        attn = p * pl.reciprocal(denom, approx=True)            # EUP slot
        ctx = jnp.dot(attn.astype(jnp.bfloat16), enc_b,
                      preferred_element_type=jnp.float32)       # (BT, D) f32

        h = tgt.astype(jnp.float32) + ctx
        h_scratch[...] = h.astype(jnp.bfloat16)

        # masked mean pooling of encoder features (as a matmul)
        pmask = pmask_ref[...]                                  # (B, BS) f32 {0,1}
        msum = jnp.sum(pmask, axis=-1, keepdims=True)
        inv_cnt = pl.reciprocal(jnp.maximum(msum, 1.0), approx=True)
        pooled = jnp.dot(pmask.astype(jnp.bfloat16), enc_b,
                         preferred_element_type=jnp.float32) * inv_cnt   # (B, D)

        # contrastive head, packed lane-dense: [proj(Dp) | bin(2) | zero pad]
        head = jnp.dot(pooled.astype(jnp.bfloat16), w_head_ref[...],
                       preferred_element_type=jnp.float32) + b_head_ref[...]
        col = lax.broadcasted_iota(jnp.int32, head.shape, 1)
        is_proj = col < d_proj
        sq = jnp.sum(jnp.where(is_proj, head * head, 0.0),
                     axis=-1, keepdims=True)
        inv_norm = lax.rsqrt(sq + 1e-12)
        head_ref[...] = jnp.where(is_proj, head * inv_norm, head)

    # per-vocab-tile decoder projection
    logits_ref[...] = (jnp.dot(h_scratch[...], w_out_ref[...],
                               preferred_element_type=jnp.float32)
                       + b_out_ref[...])


def fused_forward(src_emb, tgt_emb, attn_bias, pool_mask,
                  w_enc, b_enc, w_head, b_head, w_out, b_out,
                  *, d_proj, v_tile):
    BS, D = src_emb.shape
    BT = tgt_emb.shape[0]
    B = pool_mask.shape[0]
    V = w_out.shape[1]
    HP = w_head.shape[1]
    assert V % v_tile == 0 and v_tile % 128 == 0
    nv = V // v_tile

    kernel = functools.partial(_fused_kernel, d_proj=d_proj,
                               scale=1.0 / math.sqrt(D))
    # NOTE: the constant-index weight blocks could additionally be marked
    # pipeline_mode=pl.Buffered(1) to halve resident-weight VMEM at large V.
    return pl.pallas_call(
        kernel,
        out_shape=(jax.ShapeDtypeStruct((BT, V), jnp.float32),
                   jax.ShapeDtypeStruct((B, HP), jnp.float32)),
        grid=(nv,),
        in_specs=[
            pl.BlockSpec((BS, D), lambda v: (0, 0)),        # src_emb (bf16)
            pl.BlockSpec((BT, D), lambda v: (0, 0)),        # tgt_emb (bf16)
            pl.BlockSpec((BT, BS), lambda v: (0, 0)),       # attn bias (f32)
            pl.BlockSpec((B, BS), lambda v: (0, 0)),        # pool mask (f32)
            pl.BlockSpec((D, D), lambda v: (0, 0)),         # w_enc (bf16)
            pl.BlockSpec((1, D), lambda v: (0, 0)),         # b_enc (f32)
            pl.BlockSpec((D, HP), lambda v: (0, 0)),        # w_head (bf16)
            pl.BlockSpec((1, HP), lambda v: (0, 0)),        # b_head (f32)
            pl.BlockSpec((D, v_tile), lambda v: (0, v)),    # w_out tile (bf16)
            pl.BlockSpec((1, v_tile), lambda v: (0, v)),    # b_out tile (f32)
        ],
        out_specs=(pl.BlockSpec((BT, v_tile), lambda v: (0, v)),  # logits
                   pl.BlockSpec((B, HP), lambda v: (0, 0))),      # packed head
        scratch_shapes=[pltpu.VMEM((BT, D), jnp.bfloat16)],
        compiler_params=pltpu.CompilerParams(
            dimension_semantics=("arbitrary",)),
    )(src_emb, tgt_emb, attn_bias, pool_mask,
      w_enc, b_enc, w_head, b_head, w_out, b_out)


# ---------------------------------------------------------------------------
# Model wrapper (parameter init + glue: embedding gather, mask construction,
# output slicing).  Weights stored in bf16 (MXU-native), biases in f32.
# ---------------------------------------------------------------------------
class SequenceGeneratorModelPallas:
    def __init__(self, vocab_size, d_model, d_proj, key, v_tile=256):
        assert d_model % 128 == 0, "d_model should be lane-dense (multiple of 128)"
        self.vocab_size = vocab_size
        self.d_model = d_model
        self.d_proj = d_proj
        self.v_tile = v_tile
        # packed head width: [proj(Dp) | bin(2) | zero pad] -> multiple of 128
        self.head_pack = max(128, ((d_proj + 2 + 127) // 128) * 128)

        k = jax.random.split(key, 6)
        s = 1.0 / math.sqrt(d_model)
        self.embed = (jax.random.normal(k[0], (vocab_size, d_model), jnp.float32)
                      * s).astype(jnp.bfloat16)
        self.w_enc = (jax.random.normal(k[1], (d_model, d_model), jnp.float32)
                      * s).astype(jnp.bfloat16)
        self.b_enc = jnp.zeros((1, d_model), jnp.float32)
        self.w_out = (jax.random.normal(k[2], (d_model, vocab_size), jnp.float32)
                      * s).astype(jnp.bfloat16)
        self.b_out = jnp.zeros((1, vocab_size), jnp.float32)

        w_proj = jax.random.normal(k[3], (d_model, d_proj), jnp.float32) * s
        w_bin = jax.random.normal(k[4], (d_model, 2), jnp.float32) * s
        pad = self.head_pack - d_proj - 2
        self.w_head = jnp.concatenate(
            [w_proj, w_bin, jnp.zeros((d_model, pad), jnp.float32)],
            axis=1).astype(jnp.bfloat16)                        # (D, head_pack)
        self.b_head = jnp.zeros((1, self.head_pack), jnp.float32)

    def forward(self, src_tokens, tgt_tokens, src_seq_len=None, tgt_seq_len=None,
                first=None):
        B, S = src_tokens.shape
        T = tgt_tokens.shape[1]
        D, V, Dp = self.d_model, self.vocab_size, self.d_proj
        if src_seq_len is None:
            src_seq_len = jnp.full((B,), S, jnp.int32)

        # glue: embedding gather (bf16) with batch folded into the M dim
        src_emb = self.embed[src_tokens].reshape(B * S, D)       # (B*S, D)
        tgt_emb = self.embed[tgt_tokens].reshape(B * T, D)       # (B*T, D)

        # block-diagonal attention bias (also carries src-length mask) and
        # pooling mask, built once here so the kernel does no transposes.
        batch_k = jnp.repeat(jnp.arange(B), S)                   # (B*S,)
        pos_k = jnp.tile(jnp.arange(S), B)                       # (B*S,)
        key_valid = pos_k < src_seq_len[batch_k]                 # (B*S,)
        batch_q = jnp.repeat(jnp.arange(B), T)                   # (B*T,)
        same = batch_q[:, None] == batch_k[None, :]              # (B*T, B*S)
        attn_bias = jnp.where(same & key_valid[None, :], 0.0, -1e9
                              ).astype(jnp.float32)
        pool_mask = ((jnp.arange(B)[:, None] == batch_k[None, :])
                     & key_valid[None, :]).astype(jnp.float32)   # (B, B*S)

        logits_flat, head_out = fused_forward(
            src_emb, tgt_emb, attn_bias, pool_mask,
            self.w_enc, self.b_enc, self.w_head, self.b_head,
            self.w_out, self.b_out,
            d_proj=Dp, v_tile=self.v_tile)

        generate_logits = logits_flat.reshape(B, T, V)
        sup_cont_feats = head_out[:, :Dp]
        bin_logits = head_out[:, Dp:Dp + 2]

        # TODO(synk): the original contrastive_model's label construction is not
        # defined in the provided source; deterministic stand-in labels below.
        implicit_labels = tgt_tokens[:, 0].astype(jnp.int32)
        bin_labels = (src_seq_len > (S // 2)).astype(jnp.int32)

        return {
            'pred': generate_logits,
            'sup_cont_feats': sup_cont_feats,
            'imp_label': implicit_labels,
            'bin_pred': bin_logits,
            'bin_label': bin_labels,
        }


if __name__ == "__main__":
    B, S, T, D, V, Dp = 2, 8, 8, 128, 512, 16
    key = jax.random.PRNGKey(0)
    k_tok_s, k_tok_t, k_model = jax.random.split(key, 3)

    src_tokens = jax.random.randint(k_tok_s, (B, S), 0, V, dtype=jnp.int32)
    tgt_tokens = jax.random.randint(k_tok_t, (B, T), 0, V, dtype=jnp.int32)
    src_seq_len = jnp.array([S, 5], dtype=jnp.int32)
    tgt_seq_len = jnp.array([T, 6], dtype=jnp.int32)

    model = SequenceGeneratorModelPallas(V, D, Dp, k_model, v_tile=256)
    out = model.forward(src_tokens, tgt_tokens, src_seq_len, tgt_seq_len)
    jax.block_until_ready(out)

    assert out['pred'].shape == (B, T, V)
    assert out['sup_cont_feats'].shape == (B, Dp)
    assert out['bin_pred'].shape == (B, 2)
    assert out['imp_label'].shape == (B,)
    assert out['bin_label'].shape == (B,)
    assert bool(jnp.all(jnp.isfinite(out['pred'])))
    assert bool(jnp.all(jnp.isfinite(out['sup_cont_feats'])))
    assert bool(jnp.all(jnp.isfinite(out['bin_pred'])))
    # normalized contrastive features should have unit L2 norm
    norms = jnp.sqrt(jnp.sum(out['sup_cont_feats'] ** 2, axis=-1))
    assert bool(jnp.all(jnp.abs(norms - 1.0) < 1e-2))
    print("KERNEL_OK")
</pallas_src>

<mosaic_0001>
module attributes {stable_mosaic.version = 11 : i64} {
  func.func @_fused_kernel(%arg0: i32, %arg1: memref<16x128xbf16, #tpu.memory_space<vmem>>, %arg2: memref<16x128xbf16, #tpu.memory_space<vmem>>, %arg3: memref<16x16xf32, #tpu.memory_space<vmem>>, %arg4: memref<2x16xf32, #tpu.memory_space<vmem>>, %arg5: memref<128x128xbf16, #tpu.memory_space<vmem>>, %arg6: memref<1x128xf32, #tpu.memory_space<vmem>>, %arg7: memref<128x128xbf16, #tpu.memory_space<vmem>>, %arg8: memref<1x128xf32, #tpu.memory_space<vmem>>, %arg9: memref<128x256xbf16, #tpu.memory_space<vmem>>, %arg10: memref<1x256xf32, #tpu.memory_space<vmem>>, %arg11: memref<16x256xf32, #tpu.memory_space<vmem>>, %arg12: memref<2x128xf32, #tpu.memory_space<vmem>>, %arg13: memref<16x128xbf16, #tpu.memory_space<vmem>>) attributes {dimension_semantics = [#tpu.dimension_semantics<arbitrary>], iteration_bounds = array<i64: 2>, scalar_prefetch = 0 : i64, scratch_operands = 1 : i64, tpu.core_type = #tpu.core_type<tc>, window_params = [{pipeline_mode = #tpu.pipeline_mode<synchronous>, transform_indices = @transform_0, window_bounds = array<i64: 16, 128>}, {pipeline_mode = #tpu.pipeline_mode<synchronous>, transform_indices = @transform_1, window_bounds = array<i64: 16, 128>}, {pipeline_mode = #tpu.pipeline_mode<synchronous>, transform_indices = @transform_2, window_bounds = array<i64: 16, 16>}, {pipeline_mode = #tpu.pipeline_mode<synchronous>, transform_indices = @transform_3, window_bounds = array<i64: 2, 16>}, {pipeline_mode = #tpu.pipeline_mode<synchronous>, transform_indices = @transform_4, window_bounds = array<i64: 128, 128>}, {pipeline_mode = #tpu.pipeline_mode<synchronous>, transform_indices = @transform_5, window_bounds = array<i64: 1, 128>}, {pipeline_mode = #tpu.pipeline_mode<synchronous>, transform_indices = @transform_6, window_bounds = array<i64: 128, 128>}, {pipeline_mode = #tpu.pipeline_mode<synchronous>, transform_indices = @transform_7, window_bounds = array<i64: 1, 128>}, {transform_indices = @transform_8, window_bounds = array<i64: 128, 256>}, {transform_indices = @transform_9, window_bounds = array<i64: 1, 256>}, {transform_indices = @transform_10, window_bounds = array<i64: 16, 256>}, {pipeline_mode = #tpu.pipeline_mode<synchronous>, transform_indices = @transform_11, window_bounds = array<i64: 2, 128>}]} {
    %c0_i32 = arith.constant 0 : i32
    %0 = arith.cmpi eq, %arg0, %c0_i32 : i32
    %1 = arith.extui %0 : i1 to i32
    %c0_i32_0 = arith.constant 0 : i32
    %2 = arith.cmpi ne, %1, %c0_i32_0 : i32
    scf.if %2 {
      %c0_8 = arith.constant 0 : index
      %c0_9 = arith.constant 0 : index
      %10 = vector.load %arg1[%c0_8, %c0_9] : memref<16x128xbf16, #tpu.memory_space<vmem>>, vector<16x128xbf16>
      %c0_10 = arith.constant 0 : index
      %c0_11 = arith.constant 0 : index
      %11 = vector.load %arg2[%c0_10, %c0_11] : memref<16x128xbf16, #tpu.memory_space<vmem>>, vector<16x128xbf16>
      %c0_12 = arith.constant 0 : index
      %c0_13 = arith.constant 0 : index
      %12 = vector.load %arg5[%c0_12, %c0_13] : memref<128x128xbf16, #tpu.memory_space<vmem>>, vector<128x128xbf16>
      %cst_14 = arith.constant dense<0.000000e+00> : vector<16x128xf32>
      %13 = tpu.matmul %10, %12, %cst_14 {dimension_numbers = #tpu.dot_dimension_numbers<[1], [0], [0], [1], [0, 0, 1, 1], [], []>} : vector<16x128xbf16>, vector<128x128xbf16>, vector<16x128xf32> -> vector<16x128xf32>
      %c0_15 = arith.constant 0 : index
      %c0_16 = arith.constant 0 : index
      %14 = vector.load %arg6[%c0_15, %c0_16] : memref<1x128xf32, #tpu.memory_space<vmem>>, vector<1x128xf32>
      %15 = vector.broadcast %14 : vector<1x128xf32> to vector<16x128xf32>
      %16 = arith.addf %13, %15 : vector<16x128xf32>
      %cst_17 = arith.constant 0.000000e+00 : f32
      %17 = vector.broadcast %cst_17 : f32 to vector<16x128xf32>
      %18 = arith.maximumf %16, %17 : vector<16x128xf32>
      %19 = arith.truncf %18 : vector<16x128xf32> to vector<16x128xbf16>
      %cst_18 = arith.constant dense<0.000000e+00> : vector<16x16xf32>
      %20 = tpu.matmul %11, %19, %cst_18 {dimension_numbers = #tpu.dot_dimension_numbers<[1], [1], [0], [0], [0, 0, 1, 0], [], []>} : vector<16x128xbf16>, vector<16x128xbf16>, vector<16x16xf32> -> vector<16x16xf32>
      %cst_19 = arith.constant 0.0883883461 : f32
      %21 = vector.broadcast %cst_19 : f32 to vector<16x16xf32>
      %22 = arith.mulf %20, %21 : vector<16x16xf32>
      %c0_20 = arith.constant 0 : index
      %c0_21 = arith.constant 0 : index
      %23 = vector.load %arg3[%c0_20, %c0_21] : memref<16x16xf32, #tpu.memory_space<vmem>>, vector<16x16xf32>
      %24 = arith.addf %22, %23 : vector<16x16xf32>
      %cst_22 = arith.constant dense<0xFF800000> : vector<16xf32>
      %25 = vector.multi_reduction <maximumf>, %24, %cst_22 [1] : vector<16x16xf32> to vector<16xf32>
      %26 = vector.shape_cast %25 : vector<16xf32> to vector<16x1xf32>
      %27 = vector.broadcast %26 : vector<16x1xf32> to vector<16x16xf32>
      %28 = arith.subf %24, %27 : vector<16x16xf32>
      %29 = math.exp %28 : vector<16x16xf32>
      %cst_23 = arith.constant dense<0.000000e+00> : vector<16xf32>
      %30 = vector.multi_reduction <add>, %29, %cst_23 [1] : vector<16x16xf32> to vector<16xf32>
      %31 = vector.shape_cast %30 : vector<16xf32> to vector<16x1xf32>
      %32 = tpu.reciprocal %31 {approx = true} : vector<16x1xf32> -> vector<16x1xf32>
      %33 = vector.broadcast %32 : vector<16x1xf32> to vector<16x16xf32>
      %34 = arith.mulf %29, %33 : vector<16x16xf32>
      %35 = arith.truncf %34 : vector<16x16xf32> to vector<16x16xbf16>
      %cst_24 = arith.constant dense<0.000000e+00> : vector<16x128xf32>
      %36 = tpu.matmul %35, %19, %cst_24 {dimension_numbers = #tpu.dot_dimension_numbers<[1], [0], [0], [1], [0, 0, 1, 1], [], []>} : vector<16x16xbf16>, vector<16x128xbf16>, vector<16x128xf32> -> vector<16x128xf32>
      %37 = arith.extf %11 : vector<16x128xbf16> to vector<16x128xf32>
      %38 = arith.addf %37, %36 : vector<16x128xf32>
      %39 = arith.truncf %38 : vector<16x128xf32> to vector<16x128xbf16>
      %c0_25 = arith.constant 0 : index
      %c0_26 = arith.constant 0 : index
      %40 = vector.load %arg13[%c0_25, %c0_26] : memref<16x128xbf16, #tpu.memory_space<vmem>>, vector<16x128xbf16>
      tpu.vector_store %arg13[%c0_25, %c0_26], %39 {strides = array<i32>} : memref<16x128xbf16, #tpu.memory_space<vmem>>, vector<16x128xbf16>,
      %c0_27 = arith.constant 0 : index
      %c0_28 = arith.constant 0 : index
      %41 = vector.load %arg4[%c0_27, %c0_28] : memref<2x16xf32, #tpu.memory_space<vmem>>, vector<2x16xf32>
      %cst_29 = arith.constant dense<0.000000e+00> : vector<2xf32>
      %42 = vector.multi_reduction <add>, %41, %cst_29 [1] : vector<2x16xf32> to vector<2xf32>
      %43 = vector.shape_cast %42 : vector<2xf32> to vector<2x1xf32>
      %cst_30 = arith.constant 1.000000e+00 : f32
      %44 = vector.broadcast %cst_30 : f32 to vector<2x1xf32>
      %45 = arith.maximumf %43, %44 : vector<2x1xf32>
      %46 = tpu.reciprocal %45 {approx = true} : vector<2x1xf32> -> vector<2x1xf32>
      %47 = arith.truncf %41 : vector<2x16xf32> to vector<2x16xbf16>
      %cst_31 = arith.constant dense<0.000000e+00> : vector<2x128xf32>
      %48 = tpu.matmul %47, %19, %cst_31 {dimension_numbers = #tpu.dot_dimension_numbers<[1], [0], [0], [1], [0, 0, 1, 1], [], []>} : vector<2x16xbf16>, vector<16x128xbf16>, vector<2x128xf32> -> vector<2x128xf32>
      %49 = vector.broadcast %46 : vector<2x1xf32> to vector<2x128xf32>
      %50 = arith.mulf %48, %49 : vector<2x128xf32>
      %51 = arith.truncf %50 : vector<2x128xf32> to vector<2x128xbf16>
      %c0_32 = arith.constant 0 : index
      %c0_33 = arith.constant 0 : index
      %52 = vector.load %arg7[%c0_32, %c0_33] : memref<128x128xbf16, #tpu.memory_space<vmem>>, vector<128x128xbf16>
      %cst_34 = arith.constant dense<0.000000e+00> : vector<2x128xf32>
      %53 = tpu.matmul %51, %52, %cst_34 {dimension_numbers = #tpu.dot_dimension_numbers<[1], [0], [0], [1], [0, 0, 1, 1], [], []>} : vector<2x128xbf16>, vector<128x128xbf16>, vector<2x128xf32> -> vector<2x128xf32>
      %c0_35 = arith.constant 0 : index
      %c0_36 = arith.constant 0 : index
      %54 = vector.load %arg8[%c0_35, %c0_36] : memref<1x128xf32, #tpu.memory_space<vmem>>, vector<1x128xf32>
      %55 = vector.broadcast %54 : vector<1x128xf32> to vector<2x128xf32>
      %56 = arith.addf %53, %55 : vector<2x128xf32>
      %57 = tpu.iota {dimensions = array<i32: 1>} : vector<2x128xi32>
      %c16_i32 = arith.constant 16 : i32
      %58 = vector.broadcast %c16_i32 : i32 to vector<2x128xi32>
      %59 = arith.cmpi slt, %57, %58 : vector<2x128xi32>
      %60 = arith.mulf %56, %56 : vector<2x128xf32>
      %cst_37 = arith.constant 0.000000e+00 : f32
      %61 = vector.broadcast %cst_37 : f32 to vector<2x128xf32>
      %62 = arith.select %59, %60, %61 : vector<2x128xi1>, vector<2x128xf32>
      %cst_38 = arith.constant dense<0.000000e+00> : vector<2xf32>
      %63 = vector.multi_reduction <add>, %62, %cst_38 [1] : vector<2x128xf32> to vector<2xf32>
      %64 = vector.shape_cast %63 : vector<2xf32> to vector<2x1xf32>
      %cst_39 = arith.constant 9.99999996E-13 : f32
      %65 = vector.broadcast %cst_39 : f32 to vector<2x1xf32>
      %66 = arith.addf %64, %65 : vector<2x1xf32>
      %67 = math.rsqrt %66 : vector<2x1xf32>
      %68 = vector.broadcast %67 : vector<2x1xf32> to vector<2x128xf32>
      %69 = arith.mulf %56, %68 : vector<2x128xf32>
      %70 = arith.select %59, %69, %56 : vector<2x128xi1>, vector<2x128xf32>
      %c0_40 = arith.constant 0 : index
      %c0_41 = arith.constant 0 : index
      %71 = vector.load %arg12[%c0_40, %c0_41] : memref<2x128xf32, #tpu.memory_space<vmem>>, vector<2x128xf32>
      tpu.vector_store %arg12[%c0_40, %c0_41], %70 {strides = array<i32>} : memref<2x128xf32, #tpu.memory_space<vmem>>, vector<2x128xf32>,
    } else {
    }
    %c0 = arith.constant 0 : index
    %c0_1 = arith.constant 0 : index
    %3 = vector.load %arg13[%c0, %c0_1] : memref<16x128xbf16, #tpu.memory_space<vmem>>, vector<16x128xbf16>
    %c0_2 = arith.constant 0 : index
    %c0_3 = arith.constant 0 : index
    %4 = vector.load %arg9[%c0_2, %c0_3] : memref<128x256xbf16, #tpu.memory_space<vmem>>, vector<128x256xbf16>
    %cst = arith.constant dense<0.000000e+00> : vector<16x256xf32>
    %5 = tpu.matmul %3, %4, %cst {dimension_numbers = #tpu.dot_dimension_numbers<[1], [0], [0], [1], [0, 0, 1, 1], [], []>} : vector<16x128xbf16>, vector<128x256xbf16>, vector<16x256xf32> -> vector<16x256xf32>
    %c0_4 = arith.constant 0 : index
    %c0_5 = arith.constant 0 : index
    %6 = vector.load %arg10[%c0_4, %c0_5] : memref<1x256xf32, #tpu.memory_space<vmem>>, vector<1x256xf32>
    %7 = vector.broadcast %6 : vector<1x256xf32> to vector<16x256xf32>
    %8 = arith.addf %5, %7 : vector<16x256xf32>
    %c0_6 = arith.constant 0 : index
    %c0_7 = arith.constant 0 : index
    %9 = vector.load %arg11[%c0_6, %c0_7] : memref<16x256xf32, #tpu.memory_space<vmem>>, vector<16x256xf32>
    tpu.vector_store %arg11[%c0_6, %c0_7], %8 {strides = array<i32>} : memref<16x256xf32, #tpu.memory_space<vmem>>, vector<16x256xf32>,
    return
  }
  func.func @transform_0(%arg0: i32) -> (i32, i32) {
    %c0_i32 = arith.constant 0 : i32
    %c0_i32_0 = arith.constant 0 : i32
    %c0_i32_1 = arith.constant 0 : i32
    return %c0_i32, %c0_i32_0 : i32, i32
  }
  func.func @transform_1(%arg0: i32) -> (i32, i32) {
    %c0_i32 = arith.constant 0 : i32
    %c0_i32_0 = arith.constant 0 : i32
    %c0_i32_1 = arith.constant 0 : i32
    return %c0_i32, %c0_i32_0 : i32, i32
  }
  func.func @transform_2(%arg0: i32) -> (i32, i32) {
    %c0_i32 = arith.constant 0 : i32
    %c0_i32_0 = arith.constant 0 : i32
    %c0_i32_1 = arith.constant 0 : i32
    return %c0_i32, %c0_i32_0 : i32, i32
  }
  func.func @transform_3(%arg0: i32) -> (i32, i32) {
    %c0_i32 = arith.constant 0 : i32
    %c0_i32_0 = arith.constant 0 : i32
    %c0_i32_1 = arith.constant 0 : i32
    return %c0_i32, %c0_i32_0 : i32, i32
  }
  func.func @transform_4(%arg0: i32) -> (i32, i32) {
    %c0_i32 = arith.constant 0 : i32
    %c0_i32_0 = arith.constant 0 : i32
    %c0_i32_1 = arith.constant 0 : i32
    return %c0_i32, %c0_i32_0 : i32, i32
  }
  func.func @transform_5(%arg0: i32) -> (i32, i32) {
    %c0_i32 = arith.constant 0 : i32
    %c0_i32_0 = arith.constant 0 : i32
    %c0_i32_1 = arith.constant 0 : i32
    return %c0_i32, %c0_i32_0 : i32, i32
  }
  func.func @transform_6(%arg0: i32) -> (i32, i32) {
    %c0_i32 = arith.constant 0 : i32
    %c0_i32_0 = arith.constant 0 : i32
    %c0_i32_1 = arith.constant 0 : i32
    return %c0_i32, %c0_i32_0 : i32, i32
  }
  func.func @transform_7(%arg0: i32) -> (i32, i32) {
    %c0_i32 = arith.constant 0 : i32
    %c0_i32_0 = arith.constant 0 : i32
    %c0_i32_1 = arith.constant 0 : i32
    return %c0_i32, %c0_i32_0 : i32, i32
  }
  func.func @transform_8(%arg0: i32) -> (i32, i32) {
    %c0_i32 = arith.constant 0 : i32
    %c0_i32_0 = arith.constant 0 : i32
    return %c0_i32, %arg0 : i32, i32
  }
  func.func @transform_9(%arg0: i32) -> (i32, i32) {
    %c0_i32 = arith.constant 0 : i32
    %c0_i32_0 = arith.constant 0 : i32
    return %c0_i32, %arg0 : i32, i32
  }
  func.func @transform_10(%arg0: i32) -> (i32, i32) {
    %c0_i32 = arith.constant 0 : i32
    %c0_i32_0 = arith.constant 0 : i32
    return %c0_i32, %arg0 : i32, i32
  }
  func.func @transform_11(%arg0: i32) -> (i32, i32) {
    %c0_i32 = arith.constant 0 : i32
    %c0_i32_0 = arith.constant 0 : i32
    %c0_i32_1 = arith.constant 0 : i32
    return %c0_i32, %c0_i32_0 : i32, i32
  }
}

</mosaic_0001>

<bundles_post_ra>
// kernel: tpu_custom_call.1
= control target key start
LH: loop header
LB: loop body
LE: loop exit
PB: predicated region body
PF: predicated region fallthrough
CT: control target
= control target key end

     0   :  { %s2283_s0 = inlined_call_operand.hbm [shape: bf16[16,128], index: 0, kind: input, shape index: {}]   ;;  %s2284_s1 = inlined_call_operand.hbm [shape: bf16[16,128], index: 1, kind: input, shape index: {}]   ;;  %s2285_s2 = inlined_call_operand.hbm [shape: f32[16,16], index: 2, kind: input, shape index: {}]   ;;  %s2286_s3 = inlined_call_operand.vmem [shape: f32[2,16], index: 3, kind: input, shape index: {}]   ;;  %s2287_s4 = inlined_call_operand.hbm [shape: bf16[128,128], index: 4, kind: input, shape index: {}]   ;;  %s2288_s5 = inlined_call_operand.vmem [shape: f32[1,128], index: 5, kind: input, shape index: {}]   ;;  %s2289_s6 = inlined_call_operand.hbm [shape: bf16[128,128], index: 6, kind: input, shape index: {}]   ;;  %s2290_s7 = inlined_call_operand.vmem [shape: f32[1,128], index: 7, kind: input, shape index: {}]   ;;  %s2291_s8 = inlined_call_operand.hbm [shape: bf16[128,512], index: 8, kind: input, shape index: {}]   ;;  %s2292_s9 = inlined_call_operand.vmem [shape: f32[1,512], index: 9, kind: input, shape index: {}]   ;;  %s2293_s10 = inlined_call_operand.hbm [shape: f32[16,512], index: 10, kind: output, shape index: {0}]   ;;  %s2294_s11 = inlined_call_operand.hbm [shape: f32[2,128], index: 11, kind: output, shape index: {1}]  }
   0x1   :  { %2303 = sst [smem:[#allocation24_spill]] %s2283_s0 }
   0x2   :  { %2304 = sst [smem:[#allocation25_spill]] %s2284_s1 }
   0x3   :  { %2305 = sst [smem:[#allocation26_spill]] %s2285_s2 }
   0x4   :  { %2306 = sst [smem:[#allocation27_spill]] %s2287_s4 }
   0x5   :  { %17 = vsyncpa [#allocation4], 0 }
   0x6   :  { %18 = vsyncpa [#allocation7], 0 }
   0x7   :  { %19 = vsyncpa [#allocation10], 0 }
   0x8   :  { %20 = vsyncpa [#allocation13], 0 }
   0x9   :  { %22 = vsyncpa [#allocation13 + $0x1], 0 }
   0xa   :  { %23 = vsyncpa [#allocation5], 0 }
   0xb   :  { %25 = vsyncpa [#allocation5 + $0x1], 0 }
   0xc   :  { %26 = vsyncpa [#allocation16], 0  ;;  %s1946_s17 = smov 0   ;;  %s1948_s18 = smov 0  }
   0xd   :  { %s1950_s19 = smov 0   ;;  %s1952_s20 = smov 0  }
   0xe LB: > { %s1967_s21 = sadd.s32 4294967295, %s1865_s20   ;;  %s1272_s22 = sadd.s32 4294967294, %s1865_s20   ;;  %s1865_s20 = sphi %s1952_s20, %s2343_s20   ;;  %s1861_s19 = sphi %s1950_s19, %s2342_s19   ;;  %s1857_s18 = sphi %s1948_s18, %s2341_s18   ;;  %s1853_s17 = sphi %s1946_s17, %s2340_s17  }
   0xf   : > { %p220_p0 = scmp.ne.s32.totalorder %s1857_s18, %s1853_s17  ;;  %p2295_p1 = scmp.eq.s32.totalorder %s1967_s21, 0 }
  0x10   : > { %p276_p3 = scmp.eq.s32.totalorder %s1272_s22, 1  ;;  %p1273_p5 = scmp.ge.s32.totalorder %s1865_s20, 1 }
  0x11   : > { %p1976_p4 = por %p2295_p1, %p220_p0  ;;  %p304_p7 = scmp.lt.s32.totalorder %s1865_s20, 3 }
  0x12   : > { %p1981_p6 = por %p276_p3, %p220_p0  ;;  %s1867_s26 = smov [#allocation6]  }
  0x13   : > { %s2307_s23 = scalar_select %p1976_p4, 1, 0 }
  0x14   : > { %s2308_s24 = scalar_select %p1981_p6, 1, 0 }
  0x15   : > { %p1987_p9 = pnand %p1273_p5, %p304_p7  ;;  %s329_s27 = sshll.u32 %s1867_s26, 4  ;;  %s330_s27 = int_to_ptr.vmem [resolvable:$true] %s329_s27 }
  0x16   : > { %2309 = sst [smem:[#allocation23_spill]] %s2308_s24  ;;  %s1868_s29 = smov [#allocation9]  }
  0x17   : > { %s2310_s25 = scalar_select %p1987_p9, 1, 0 }
  0x18   : > { %p1460_p11 = pneg %p1987_p9  ;;  %s358_s30 = sshll.u32 %s1868_s29, 4  ;;  %s359_s30 = int_to_ptr.vmem [resolvable:$true] %s358_s30 }
  0x19   : > { %s1869_s12 = smov [#allocation3]   ;;  %s1614_s15 = scalar_lea.vmem %s330_s27, 128 }
  0x1a   : > { %p1996_p12 = pnand %p1460_p11, %p2295_p1  ;;  %s316_s13 = sshll.u32 %s1869_s12, 4  ;;  %s317_s13 = int_to_ptr.vmem [resolvable:$true] %s316_s13 }
  0x1b   : > { %p1615_p0 = scmp.ne.s32.totalorder %s330_s27, %s1614_s15  ;;  %p1622_p7 = scmp.lt.s32.totalorder %s330_s27, %s330_s27 }
  0x1c   : > { %p2002_p13 = pneg %p1996_p12  ;;  %p1623_p11 = scmp.lt.s32.totalorder %s1614_s15, %s1614_s15 }
  0x1e   : > { %p1617_p3 = pnand %p1615_p0, %p2002_p13  ;;  %p1624_p10 = por %p1623_p11, %p1622_p7 }
  0x20   : > { %p1618_p5 = pneg %p1617_p3 }
  0x22   : > { %p1625_p8 = pnand %p1624_p10, %p1618_p5 }
  0x24   : > { %1628 = shalt.err (!%p1625_p8)
}
  0x25   : > { %s2297_s16 = smov 64   ;;  %s1871_s22 = smov 4  }
  0x26   : > { %s2313_s1 = sld [smem:[#allocation25_spill]]  ;;  %s1640_s12 = scalar_lea.vmem %s359_s30, 1024 }
  0x27   : > { %p1641_p0 = scmp.ne.s32.totalorder %s359_s30, %s1640_s12  ;;  %p1648_p7 = scmp.lt.s32.totalorder %s359_s30, %s359_s30 }
  0x28   : > { %p1649_p10 = scmp.lt.s32.totalorder %s1640_s12, %s1640_s12 }
  0x29   : > { %p1643_p3 = pnand %p1641_p0, %p2002_p13 }
  0x2a   : > { %p1650_p8 = por %p1649_p10, %p1648_p7 }
  0x2b   : > { %p1644_p1 = pneg %p1643_p3 }
  0x2c   : > { %1466 = dma.hbm_to_vmem [thread:$0]  (!%p1996_p12), %s2313_s1, 128, %s330_s27, [#allocation7], %s2297_s16, %s2297_s16, %s1871_s22  }
  0x2d   : > { %p1651_p5 = pnand %p1650_p8, %p1644_p1 }
  0x2f   : > { %1654 = shalt.err (!%p1651_p5)
}
  0x30   : > { %s2314_s4 = sld [smem:[#allocation27_spill]]  ;;  %s1666_s27 = scalar_lea.vmem %s317_s13, 128 }
  0x31   : > { %p1667_p11 = scmp.ne.s32.totalorder %s317_s13, %s1666_s27  ;;  %p1674_p2 = scmp.lt.s32.totalorder %s317_s13, %s317_s13 }
  0x32   : > { %p1675_p7 = scmp.lt.s32.totalorder %s1666_s27, %s1666_s27 }
  0x33   : > { %p1669_p0 = pnand %p1667_p11, %p2002_p13 }
  0x34   : > { %p1676_p1 = por %p1675_p7, %p1674_p2 }
  0x35   : > { %p1670_p3 = pneg %p1669_p0 }
  0x36   : > { %1472 = dma.hbm_to_vmem [thread:$0]  (!%p1996_p12), %s2314_s4, 1024, %s359_s30, [#allocation10], %s2297_s16, %s2297_s16, %s1871_s22  }
  0x37   : > { %p1677_p10 = pnand %p1676_p1, %p1670_p3 }
  0x39   : > { %1680 = shalt.err (!%p1677_p10)
}
  0x3a   : > { %s2315_s0 = sld [smem:[#allocation24_spill]]  ;;  %s1872_s30 = smov [#allocation8]  }
  0x3b   : > { %s342_s29 = sshll.u32 %s1872_s30, 4  ;;  %s343_s29 = int_to_ptr.vmem [resolvable:$true] %s342_s29 }
  0x3c   : > { %s1692_s12 = scalar_lea.vmem %s343_s29, 256  ;;  %p1700_p11 = scmp.lt.s32.totalorder %s343_s29, %s343_s29 }
  0x3d   : > { %p1693_p8 = scmp.ne.s32.totalorder %s343_s29, %s1692_s12  ;;  %p1701_p0 = scmp.lt.s32.totalorder %s1692_s12, %s1692_s12 }
  0x3f   : > { %p1695_p5 = pnand %p1693_p8, %p2002_p13  ;;  %p1702_p3 = por %p1701_p0, %p1700_p11 }
  0x40   : > { %1463 = dma.hbm_to_vmem [thread:$0]  (!%p1996_p12), %s2315_s0, 128, %s317_s13, [#allocation4], %s2297_s16, %s2297_s16, %s1871_s22  }
  0x41   : > { %p1696_p2 = pneg %p1695_p5 }
  0x43   : > { %p1703_p7 = pnand %p1702_p3, %p1696_p2 }
  0x45   : > { %1706 = shalt.err (!%p1703_p7)
}
  0x46   : > { %s2298_s15 = smov 128   ;;  %s2299_s27 = smov 8  }
  0x47   : > { %s2316_s2 = sld [smem:[#allocation26_spill]]  ;;  %s1875_s24 = smov [#allocation11]  }
  0x48   : > { %s374_s30 = sshll.u32 %s1875_s24, 4  ;;  %s2047_s12 = sadd.s32 1, %s1865_s20   ;;  %s375_s30 = int_to_ptr.vmem [resolvable:$true] %s374_s30 }
  0x49   : > { %s1718_s16 = scalar_lea.vmem %s375_s30, 1024  ;;  %p1726_p5 = scmp.lt.s32.totalorder %s375_s30, %s375_s30 }
  0x4a   : > { %p1719_p1 = scmp.ne.s32.totalorder %s375_s30, %s1718_s16  ;;  %p1727_p2 = scmp.lt.s32.totalorder %s1718_s16, %s1718_s16 }
  0x4c   : > { %p1721_p10 = pnand %p1719_p1, %p2002_p13  ;;  %p1728_p11 = por %p1727_p2, %p1726_p5 }
  0x4d   : > { %1469 = dma.hbm_to_vmem [thread:$0]  (!%p1996_p12), %s2316_s2, 256, %s343_s29, [#allocation7], %s2298_s15, %s2298_s15, %s2299_s27  }
  0x4e   : > { %p1722_p8 = pneg %p1721_p10 }
  0x50   : > { %p1729_p0 = pnand %p1728_p11, %p1722_p8 }
  0x52   : > { %1732 = shalt.err (!%p1729_p0)
}
  0x53   : > { %s2317_s13 = smov 64   ;;  %s204_s14 = ssub.s32 %s1865_s20, %s2047_s12 }
  0x54   : > { %1475 = dma.hbm_to_vmem [thread:$0]  (!%p1996_p12), %s2289_s6, 1024, %s375_s30, [#allocation10], %s2317_s13, %s2317_s13, %s1871_s22  }
  0x55   : > { %s207_s28 = sadd.s32 1, %s1861_s19  ;;  %p205_p13 = scmp.eq.s32.totalorder %s204_s14, 0 }
  0x56   : > { %p214_p3 = scmp.ne.s32.totalorder %s1861_s19, %s1857_s18  ;;  %p215_p7 = scmp.eq.s32.totalorder %s1865_s20, 0 }
  0x57   : > { %p1489_p1 = scmp.lt.s32.totalorder %s1865_s20, 2  ;;  %p2318_p8 = scmp.eq.s32.totalorder %s1967_s21, 1 }
  0x58   : > { %s2067_s16 = scalar_select %p205_p13, %s1861_s19, %s207_s28  }
  0x59   : > { %p216_p10 = por %p215_p7, %p214_p3  ;;  %p2071_p5 = por %p2318_p8, %p214_p3 }
  0x5a   : > { %s391_s29 = sand.u32 1, %s1861_s19   ;;  %s1341_s26 = sshll.u32 %s1865_s20, 7 }
  0x5b   : > { %s2319_s24 = scalar_select %p2071_p5, 1, 0 }
  0x5c   : > { %s1280_s15 = sshll.u32 %s391_s29, 7  ;;  %s2080_s22 = scalar_lea.hbm %s2291_s8, %s1341_s26 }
  0x5d   : > { %s395_s30 = scalar_lea.vmem [#allocation12], %s1280_s15  ;;  %p2082_p12 = pnand %p1489_p1, %p216_p10 }
  0x5e   : > { %s402_s13 = sshll.u32 %s395_s30, 4  ;;  %s2088_s28 = scalar_lea.sflag [#allocation13], %s391_s29  ;;  %s2086_s13 = int_to_ptr.vmem [resolvable:$true] %s402_s13 }
  0x5f   : > { %s1733_s1 = scalar_lea.hbm %s2080_s22, 2048  ;;  %p1735_p11 = pneg %p2082_p12 }
  0x60   : > { %p1734_p2 = scmp.ne.s32.totalorder %s2080_s22, %s1733_s1  ;;  %s1738_s15 = scalar_lea.hbm %s2291_s8, 4096 }
  0x61   : > { %p1739_p3 = scmp.lt.s32.totalorder %s2080_s22, %s2291_s8  ;;  %p1740_p7 = scmp.lt.s32.totalorder %s1738_s15, %s1733_s1 }
  0x62   : > { %p1736_p0 = pnand %p1735_p11, %p1734_p2 }
  0x63   : > { %p1741_p1 = por %p1740_p7, %p1739_p3 }
  0x64   : > { %p1737_p13 = pneg %p1736_p0 }
  0x66   : > { %p1742_p10 = pnand %p1741_p1, %p1737_p13 }
  0x68   : > { %1745 = shalt.err (!%p1742_p10)
}
  0x69   : > { %s1746_s29 = scalar_lea.vmem %s2086_s13, 2048  ;;  %s1876_s2 = smov [#allocation12]  }
  0x6a   : > { %p1747_p8 = scmp.ne.s32.totalorder %s2086_s13, %s1746_s29  ;;  %s1751_s4 = sshll.u32 %s1876_s2, 4  ;;  %s1752_s4 = int_to_ptr.vmem [resolvable:$false] %s1751_s4 }
  0x6b   : > { %s1753_s0 = scalar_lea.vmem %s1752_s4, 4096  ;;  %p1754_p0 = scmp.lt.s32.totalorder %s2086_s13, %s1752_s4 }
  0x6c   : > { %p1749_p6 = pnand %p1747_p8, %p1735_p11  ;;  %p1755_p5 = scmp.lt.s32.totalorder %s1753_s0, %s1746_s29 }
  0x6e   : > { %p1750_p2 = pneg %p1749_p6  ;;  %p1756_p4 = por %p1755_p5, %p1754_p0 }
  0x70   : > { %p1757_p9 = pnand %p1756_p4, %p1750_p2 }
  0x72   : > { %1760 = shalt.err (!%p1757_p9)
}
  0x73   : > { %s1877_s1 = smov 256   ;;  %s2321_s27 = smov 8  }
  0x74   : > { %s2322_s15 = smov 128   ;;  %p2323_p6 = scmp.ne.s32.totalorder %s2310_s25, 0 }
  0x75   : > { %1479 = dma.hbm_to_vmem [thread:$0]  (!%p2082_p12), %s2080_s22, 2048, %s2086_s13, %s2088_s28, %s1877_s1, %s2322_s15, %s2321_s27  }
  0x76   : > { %422 = sbr.rel (%p2323_p6) target bundleno = 1715 (0x6b3), region = 60  ;;  %p2324_p11 = scmp.eq.s32.totalorder (!%p2323_p6), %s1967_s21, 0 }
  0x7b   : > { %1828 = dma.done.wait (%p2324_p11), [#allocation4], 128   ;;  %p2325_p13 = pmov %p2324_p11 }
  0x7c   : > { %p2326_p4 = pmov %p2324_p11 }
  0x7d   : > { %1830 = vsyncadd (%p2325_p13), [#allocation4], 4294967168 }
  0x7e   : > { %1832 = dma.done.wait (%p2326_p4), [#allocation7], 384   ;;  %p2327_p9 = pmov %p2326_p4 }
  0x7f   : > { %p2328_p5 = pmov %p2326_p4 }
  0x80   : > { %1834 = vsyncadd (%p2327_p9), [#allocation7], 4294966912 }
  0x81   : > { %1836 = dma.done.wait (%p2328_p5), [#allocation10], 2048   ;;  %p2329_p12 = pmov %p2326_p4 }
  0x82   : > { %s2126_s2 = sand.u32 1, %s1857_s18   ;;  %p2330_p3 = scmp.ne.s32.totalorder %s2307_s23, 0 }
  0x83   : > { %1838 = vsyncadd (%p2329_p12), [#allocation10], 4294965248  ;;  %s1289_s4 = sshll.u32 %s2126_s2, 7  ;;  %s445_s25 = scalar_lea.sflag [#allocation13], %s2126_s2 }
  0x84   : > { %s2130_s22 = scalar_lea.vmem [#allocation12], %s1289_s4 }
  0x85   : > { %1840 = dma.done.wait (%p2330_p3), %s445_s25, 2048  }
  0x86   : > { %1842 = vsyncadd (%p2330_p3), %s445_s25, 4294965248  ;;  %s1290_s13 = sshll.u32 %s2126_s2, 5  ;;  %s1291_s14 = sshll.u32 %s1967_s21, 1 }
  0x87   : > { %p493_p7 = scmp.lt.s32.totalorder %s1291_s14, 3  ;;  %s2144_s29 = scalar_lea.vmem [#allocation14], %s1290_s13 }
  0x88   : > { %p2331_p1 = scmp.ne.s32.totalorder %s1967_s21, 0 }
  0x89   : > { %s2345_s14 = smov (!%p493_p7, %s1291_s14), 3 }
  0x8a   : > { %s495_s30 = scalar_lea.vmem %s2292_s9, %s2345_s14  ;;  %502 = sbr.rel (%p2331_p1) target bundleno = 1463 (0x5b7), region = 88 }
  0x8f   : > { %v1547_v0 = vld [vmem:[#allocation9 + $0x38] sm:$0xff]   ;;  %v1878_v1 = vmov 0.0   ;;  %v1548_v2 = vld [vmem:[#allocation9 + $0x30] sm:$0xff]   ;;  %vm1879_vm0 = vmmov 0   ;;  %v1549_v3 = vld [vmem:[#allocation9 + $0x28] sm:$0xff]   ;;  %vm681_vm1 = vcmask 130048  }
  0x90   : > { %1374 = vmatprep.subr.bf16.mxu0 %v1878_v1  ;;  %1400 = vmatprep.subr.bf16.mxu1 %v1878_v1  ;;  %v1550_v4 = vld [vmem:[#allocation9 + $0x20] sm:$0xff]   ;;  %v1551_v5 = vld [vmem:[#allocation9 + $0x18] sm:$0xff]   ;;  %v1552_v6 = vld [vmem:[#allocation9 + $0x10] sm:$0xff]   ;;  %vm764_vm2 = vcmask 123904   ;;  %vm932_vm4 = vcmask 1041408  }
  0x91   : > { %1375 = vmatpush3.bf16.msra.mxu0 %v1547_v0  ;;  %1390 = vmatprep.mubr.msk.bf16.mxu0 %vm1879_vm0, %v1878_v1  ;;  %v1553_v7 = vld [vmem:[#allocation9 + $0x8] sm:$0xff]   ;;  %v1554_v8 = vld [vmem:[#allocation9] sm:$0xff]   ;;  %v1293_v10 = vld [vmem:[%s2288_s5] ss:$0 sm:$0xff] }
  0x92   : > { %1376 = vmatprep.subr.bf16.mxu0 %v1878_v1  ;;  %1402 = vmatprep.mubr.msk.bf16.mxu1 %vm1879_vm0, %v1878_v1  ;;  %v1555_v9 = vld [vmem:[#allocation3] sm:$0xff]   ;;  %v2167_v20 = vld [vmem:[#allocation6] sm:$0xff]   ;;  %v677_v22 = vld [vmem:[#allocation8] sm:$0xff] }
  0x93   : > { %v678_v27 = vld [vmem:[#allocation8 + $0x8] sm:$0xff]  ;;  %v1558_v54 = vld [vmem:[#allocation11 + $0x30] sm:$0xff]   ;;  %v1559_v55 = vld [vmem:[#allocation11 + $0x28] sm:$0xff]   ;;  %v749_v0 = vunpack.c.l.bf16 %v2167_v20 }
  0x94   : > { %v763_v43 = vld [vmem:[%s2286_s3] sm:$0x3]  ;;  %v1560_v56 = vld [vmem:[#allocation11 + $0x20] sm:$0xff]   ;;  %v1562_v58 = vld [vmem:[#allocation11 + $0x10] sm:$0xff]  }
  0x95   : > { %1377 = vmatpush3.bf16.msra.mxu0 %v1548_v2  ;;  %v765_v44 = vsel %vm764_vm2, %v763_v43, 0.0  ;;  %v770_v52 = vpack.c.bf16 %v763_v43, %v763_v43  ;;  %v1557_v53 = vld [vmem:[#allocation11 + $0x38] sm:$0xff]   ;;  %v1563_v59 = vld [vmem:[#allocation11 + $0x8] sm:$0xff]   ;;  %v1564_v60 = vld [vmem:[#allocation11] sm:$0xff]   ;;  %v750_v2 = vunpack.c.h.bf16 %v2167_v20 }
  0x96   : > { %1378 = vmatprep.subr.bf16.mxu0 %v1878_v1  ;;  %v1561_v57 = vld [vmem:[#allocation11 + $0x18] sm:$0xff]  }
  0x99   : > { %1379 = vmatpush3.bf16.msra.mxu0 %v1549_v3 }
  0x9a   : > { %1380 = vmatprep.subr.bf16.mxu0 %v1878_v1 }
  0x9d   : > { %1381 = vmatpush3.bf16.msra.mxu0 %v1550_v4 }
  0x9e   : > { %1382 = vmatprep.subr.bf16.mxu0 %v1878_v1 }
  0xa1   : > { %1383 = vmatpush3.bf16.msra.mxu0 %v1551_v5 }
  0xa2   : > { %1384 = vmatprep.subr.bf16.mxu0 %v1878_v1 }
  0xa5   : > { %1385 = vmatpush3.bf16.msra.mxu0 %v1552_v6 }
  0xa6   : > { %1386 = vmatprep.subr.bf16.mxu0 %v1878_v1 }
  0xa9   : > { %1387 = vmatpush3.bf16.msra.mxu0 %v1553_v7 }
  0xaa   : > { %1388 = vmatprep.subr.bf16.mxu0 %v1878_v1 }
  0xad   : > { %1389 = vmatpush3.bf16.msra.mxu0 %v1554_v8 }
  0xae   : > { %1394 = vmatprep.subr.bf16.mxu0 %v1878_v1 }
  0xb0   : > { %1391 = vmatmul.mubr.bf16.vlgmr.msra.gmra.mxu0 %v1555_v9 }
  0xb1   : > { %1396 = vmatprep.mubr.msk.bf16.mxu0 %vm1879_vm0, %v1878_v1 }
 0x170   : > { %v618_v11 = vpop.f32.mrf.mxu0 }
 0x171   : > { %v619_v13 = vadd.f32 %v1293_v10, %v618_v11 }
 0x172   : > { %v1392_v12 = vpop.f32.mrf.mxu0 }
 0x173   : > { %v625_v17 = vmax.f32 %v619_v13, 0.0 }
 0x174   : > { %v621_v14 = vpop.f32.mrf.mxu0 }
 0x175   : > { %v622_v15 = vadd.f32 %v1293_v10, %v621_v14 }
 0x176   : > { %v1393_v16 = vpop.f32.mrf.mxu0 }
 0x177   : > { %v626_v18 = vmax.f32 %v622_v15, 0.0  ;;  %v927_v15 = vlaneseq  ;;  %v1308_v16 = vld [vmem:[%s2290_s7] ss:$0 sm:$0xff] }
 0x179   : > { %v627_v19 = vpack.c.bf16 %v626_v18, %v625_v17  ;;  %v928_v17 = vand.u32 127, %v927_v15 }
 0x17b   : > { %1395 = vmatpush3.bf16.xpose.msra.mxu0 %v627_v19  ;;  %1401 = vmatpush3.bf16.msra.mxu1 %v627_v19  ;;  %vm929_vm3 = vcmp.lt.s32.totalorder %v928_v17, 16 }
 0x17c   : > { %1406 = vmatprep.subr.bf16.mxu1 %v1878_v1 }
 0x182   : > { %1397 = vmatmul.mubr.bf16.vlgmr.msra.gmra.mxu0 %v2167_v20 }
 0x242   : > { %v668_v21 = vpop.f32.mrf.mxu0 }
 0x243   : > { %v675_v23 = vmul.f32 0.088388346, %v668_v21 }
 0x244   : > { %v1398_v24 = vpop.f32.mrf.mxu0 }
 0x245   : > { %v679_v25 = vadd.f32 %v677_v22, %v675_v23 }
 0x246   : > { %v671_v26 = vpop.f32.mrf.mxu0 }
 0x247   : > { %v676_v28 = vmul.f32 0.088388346, %v671_v26  ;;  %v682_v29 = vsel %vm681_vm1, %v679_v25, -inf }
 0x248   : > { %683 = vmax.xlane.f32.xlu0 %v682_v29  ;;  %v1399_v30 = vpop.f32.mrf.mxu0 }
 0x249   : > { %v680_v31 = vadd.f32 %v678_v27, %v676_v28 }
 0x24b   : > { %v685_v32 = vsel %vm681_vm1, %v680_v31, -inf }
 0x24c   : > { %686 = vmax.xlane.f32.xlu0 %v685_v32 }
 0x250   : > { %766 = vadd.xlane.f32.xlu0 %v765_v44 }
 0x2d1   : > { %v684_v33 = vpop.xlane.xlu0 %683 }
 0x2d2   : > { %v688_v34 = vsub.f32 %v679_v25, %v684_v33 }
 0x2d4   : > { %v690_v35 = vmul.f32 1.442695, %v688_v34 }
 0x2d5   : > { %v687_v36 = vpop.xlane.xlu0 %686 }
 0x2d6   : > { %1566 = vpow2.f32 %v690_v35  ;;  %v689_v37 = vsub.f32 %v680_v31, %v687_v36 }
 0x2d8   : > { %v692_v38 = vmul.f32 1.442695, %v689_v37 }
 0x2d9   : > { %v767_v61 = vpop.xlane.xlu0 %766 }
 0x2da   : > { %1568 = vpow2.f32 %v692_v38  ;;  %v768_v62 = vmax.f32 %v767_v61, 1.0 }
 0x2e3   : > { %v1567_v39 = vpop.eup %1566 }
 0x2e4   : > { %v694_v40 = vsel %vm681_vm1, %v1567_v39, 0.0 }
 0x2e5   : > { %695 = vadd.xlane.f32.xlu1 %v694_v40 }
 0x2e7   : > { %v1569_v41 = vpop.eup %1568 }
 0x2e8   : > { %v697_v42 = vsel %vm681_vm1, %v1569_v41, 0.0 }
 0x2e9   : > { %698 = vadd.xlane.f32.xlu1 %v697_v42 }
 0x36e   : > { %v696_v45 = vpop.xlane.xlu1 %695 }
 0x36f   : > { %1570 = vrcp.f32 %v696_v45 }
 0x372   : > { %v699_v46 = vpop.xlane.xlu1 %698 }
 0x373   : > { %1572 = vrcp.f32 %v699_v46 }
 0x374   : > { %1574 = vrcp.f32 %v768_v62 }
 0x37c   : > { %v1571_v47 = vpop.eup %1570 }
 0x37d   : > { %v702_v49 = vmul.f32 %v1571_v47, %v1567_v39 }
 0x380   : > { %v1573_v48 = vpop.eup %1572 }
 0x381   : > { %v703_v50 = vmul.f32 %v1573_v48, %v1569_v41  ;;  %v1575_v7 = vpop.eup %1574 }
 0x383   : > { %v704_v51 = vpack.c.bf16 %v703_v50, %v702_v49 }
 0x385   : > { %1403 = vmatmul.mubr.msk.bf16.vlgmr.msra.gmra.mxu1 %vm681_vm1, %v704_v51 }
 0x386   : > { %1407 = vmatpush3.bf16.msra.mxu1 %v627_v19  ;;  %1408 = vmatprep.mubr.msk.bf16.mxu1 %vm1879_vm0, %v1878_v1 }
 0x387   : > { %1412 = vmatprep.subr.bf16.mxu1 %v1878_v1 }
 0x38d   : > { %1409 = vmatmul.mubr.msk.bf16.vlgmr.msra.gmra.mxu1 %vm681_vm1, %v770_v52 }
 0x38e   : > { %1413 = vmatpush3.bf16.msra.mxu1 %v1557_v53  ;;  %1428 = vmatprep.mubr.msk.bf16.mxu1 %vm1879_vm0, %v1878_v1 }
 0x38f   : > { %1414 = vmatprep.subr.bf16.mxu1 %v1878_v1 }
 0x392   : > { %1415 = vmatpush3.bf16.msra.mxu1 %v1558_v54 }
 0x393   : > { %1416 = vmatprep.subr.bf16.mxu1 %v1878_v1 }
 0x396   : > { %1417 = vmatpush3.bf16.msra.mxu1 %v1559_v55 }
 0x397   : > { %1418 = vmatprep.subr.bf16.mxu1 %v1878_v1 }
 0x39a   : > { %1419 = vmatpush3.bf16.msra.mxu1 %v1560_v56 }
 0x39b   : > { %1420 = vmatprep.subr.bf16.mxu1 %v1878_v1 }
 0x39e   : > { %1421 = vmatpush3.bf16.msra.mxu1 %v1561_v57 }
 0x39f   : > { %1422 = vmatprep.subr.bf16.mxu1 %v1878_v1 }
 0x3a2   : > { %1423 = vmatpush3.bf16.msra.mxu1 %v1562_v58 }
 0x3a3   : > { %1424 = vmatprep.subr.bf16.mxu1 %v1878_v1 }
 0x3a6   : > { %1425 = vmatpush3.bf16.msra.mxu1 %v1563_v59 }
 0x3a7   : > { %1426 = vmatprep.subr.bf16.mxu1 %v1878_v1 }
 0x3aa   : > { %1427 = vmatpush3.bf16.msra.mxu1 %v1564_v60 }
 0x445   : > { %v742_v63 = vpop.f32.mrf.mxu1 }
 0x446   : > { %v751_v5 = vadd.f32 %v749_v0, %v742_v63 }
 0x447   : > { %v1404_v3 = vpop.f32.mrf.mxu1 }
 0x449   : > { %v745_v4 = vpop.f32.mrf.mxu1 }
 0x44a   : > { %v752_v6 = vadd.f32 %v750_v2, %v745_v4 }
 0x44b   : > { %v1405_v8 = vpop.f32.mrf.mxu1 }
 0x44c   : > { %v1348_v9 = vpack.c.bf16 %v752_v6, %v751_v5 }
 0x44d   : > { %v808_v10 = vpop.f32.mrf.mxu1 }
 0x44e   : > { %1349 = vst [vmem:[#allocation2] sm:$0xff] %v1348_v9   ;;  %v814_v1 = vmul.f32 %v1575_v7, %v808_v10 }
 0x44f   : > { %v1410_v11 = vpop.f32.mrf.mxu1 }
 0x450   : > { %v815_v12 = vpack.c.bf16 %v814_v1, %v814_v1 }
 0x451   : > { %v811_v13 = vpop.f32.mrf.mxu1 }
 0x452   : > { %1429 = vmatmul.mubr.bf16.vlgmr.msra.gmra.mxu1 %v815_v12 }
 0x453   : > { %v1411_v14 = vpop.f32.mrf.mxu1 }
 0x512   : > { %v921_v18 = vpop.f32.mrf.mxu1 }
 0x513   : > { %v922_v19 = vadd.f32 %v1308_v16, %v921_v18 }
 0x514   : > { %v1430_v20 = vpop.f32.mrf.mxu1 }
 0x515   : > { %v930_v21 = vmul.f32 %v922_v19, %v922_v19 }
 0x516   : > { %v924_v22 = vpop.f32.mrf.mxu1 }
 0x517   : > { %v931_v23 = vsel %vm929_vm3, %v930_v21, 0.0 }
 0x518   : > { %v1431_v24 = vpop.f32.mrf.mxu1  ;;  %v933_v25 = vsel %vm932_vm4, %v931_v23, 0.0 }
 0x519   : > { %934 = vadd.xlane.f32.xlu1 %v933_v25 }
 0x5a2   : > { %v935_v26 = vpop.xlane.xlu1 %934 }
 0x5a3   : > { %v936_v27 = vadd.f32 1e-12, %v935_v26 }
 0x5a5   : > { %1576 = vrsqrt.f32 %v936_v27 }
 0x5b2   : > { %v1577_v28 = vpop.eup %1576 }
 0x5b3   : > { %v938_v29 = vmul.f32 %v1577_v28, %v922_v19 }
 0x5b5   : > { %v939_v30 = vsel %vm929_vm3, %v938_v29, %v922_v19 }
 0x5b6   : > { %940 = vst [vmem:[#allocation15] sm:$0x3] %v939_v30 }
 0x5b7 PF: > { %v1578_v31 = vld [vmem:[%s2130_s22 + $0x74] ss:$8 sps:$4 sm:$0xff]   ;;  %v1580_v32 = vld [vmem:[%s2130_s22 + $0x70] ss:$8 sps:$4 sm:$0xff]   ;;  %v1880_v33 = vmov 0   ;;  %s1881_s25 = smov [#allocation15]  }
 0x5b8   : > { %1089 = vmatprep.mubr.bf16.mxu0 %v1880_v33  ;;  %1057 = vmatprep.subr.bf16.mxu0 %v1578_v31  ;;  %v1581_v34 = vld [vmem:[%s2130_s22 + $0x64] ss:$8 sps:$4 sm:$0xff]   ;;  %v1583_v35 = vld [vmem:[%s2130_s22 + $0x60] ss:$8 sps:$4 sm:$0xff]   ;;  %v1584_v36 = vld [vmem:[%s2130_s22 + $0x54] ss:$8 sps:$4 sm:$0xff]  }
 0x5b9   : > { %1058 = vmatpush1.bf16.msra.mxu0 %v1580_v32  ;;  %v1586_v37 = vld [vmem:[%s2130_s22 + $0x50] ss:$8 sps:$4 sm:$0xff]   ;;  %v1587_v38 = vld [vmem:[%s2130_s22 + $0x44] ss:$8 sps:$4 sm:$0xff]   ;;  %v1589_v39 = vld [vmem:[%s2130_s22 + $0x40] ss:$8 sps:$4 sm:$0xff]  }
 0x5ba   : > { %1059 = vmatprep.subr.bf16.mxu0 %v1581_v34  ;;  %v1590_v40 = vld [vmem:[%s2130_s22 + $0x34] ss:$8 sps:$4 sm:$0xff]   ;;  %v1592_v41 = vld [vmem:[%s2130_s22 + $0x30] ss:$8 sps:$4 sm:$0xff]   ;;  %v1593_v42 = vld [vmem:[%s2130_s22 + $0x24] ss:$8 sps:$4 sm:$0xff]  }
 0x5bb   : > { %v1595_v43 = vld [vmem:[%s2130_s22 + $0x20] ss:$8 sps:$4 sm:$0xff]   ;;  %v1596_v44 = vld [vmem:[%s2130_s22 + $0x14] ss:$8 sps:$4 sm:$0xff]   ;;  %v1598_v45 = vld [vmem:[%s2130_s22 + $0x10] ss:$8 sps:$4 sm:$0xff]  }
 0x5bc   : > { %v1599_v46 = vld [vmem:[%s2130_s22 + $0x4] ss:$8 sps:$4 sm:$0xff]   ;;  %v1601_v47 = vld [vmem:[%s2130_s22] ss:$8 sps:$4 sm:$0xff]   ;;  %v1602_v48 = vld [vmem:[#allocation2] sm:$0xff]   ;;  %s1132_s13 = sshll.u32 %s1881_s25, 4  ;;  %s1133_s13 = int_to_ptr.vmem [resolvable:$true] %s1132_s13 }
 0x5bd   : > { %1060 = vmatpush1.bf16.msra.mxu0 %v1583_v35  ;;  %s1761_s28 = scalar_lea.vmem %s1133_s13, 32  ;;  %p2332_p8 = scmp.eq.s32.totalorder %s1967_s21, 1 }
 0x5be   : > { %1061 = vmatprep.subr.bf16.mxu0 %v1584_v36  ;;  %p1762_p10 = scmp.ne.s32.totalorder %s1133_s13, %s1761_s28  ;;  %p1768_p6 = scmp.lt.s32.totalorder %s1133_s13, %s1133_s13 }
 0x5bf   : > { %p1769_p11 = scmp.lt.s32.totalorder %s1761_s28, %s1761_s28 }
 0x5c0   : > { %p1763_p2 = pnand %p1762_p10, %p2332_p8 }
 0x5c1   : > { %1062 = vmatpush1.bf16.msra.mxu0 %v1586_v37  ;;  %p1770_p13 = por %p1769_p11, %p1768_p6 }
 0x5c2   : > { %1063 = vmatprep.subr.bf16.mxu0 %v1587_v38  ;;  %p1764_p0 = pneg %p1763_p2 }
 0x5c4   : > { %p1771_p4 = pnand %p1770_p13, %p1764_p0 }
 0x5c5   : > { %1064 = vmatpush1.bf16.msra.mxu0 %v1589_v39 }
 0x5c6   : > { %1065 = vmatprep.subr.bf16.mxu0 %v1590_v40 }
 0x5c9   : > { %1066 = vmatpush1.bf16.msra.mxu0 %v1592_v41 }
 0x5ca   : > { %1067 = vmatprep.subr.bf16.mxu0 %v1593_v42 }
 0x5cd   : > { %1068 = vmatpush1.bf16.msra.mxu0 %v1595_v43 }
 0x5ce   : > { %1069 = vmatprep.subr.bf16.mxu0 %v1596_v44 }
 0x5d1   : > { %1070 = vmatpush1.bf16.msra.mxu0 %v1598_v45 }
 0x5d2   : > { %1071 = vmatprep.subr.bf16.mxu0 %v1599_v46 }
 0x5d5   : > { %1072 = vmatpush1.bf16.msra.mxu0 %v1601_v47 }
 0x5d8   : > { %1090 = vmatmul.mubr.bf16.vlgmr.msra.gmra.mxu0 %v1602_v48 }
 0x5d9   : > { %1774 = shalt.err (!%p1771_p4)
}
 0x5da   : > { %p2333_p9 = pmov %p2332_p8  ;;  %v961_v49 = vlaneseq  ;;  %v959_v52 = vld [vmem:[%s495_s30] sm:$0x3]  ;;  %s1344_s1 = sshll.u32 %s1967_s21, 8 }
 0x5db   : > { %s1118_s27 = sshll.u32 %s2144_s29, 4  ;;  %s2232_s30 = scalar_lea.hbm %s2293_s10, %s1344_s1  ;;  %s2234_s27 = int_to_ptr.vmem [resolvable:$true] %s1118_s27 }
 0x5dc   : > { %1456 = dma.vmem_to_hbm [thread:$0]  (%p2333_p9), %s1133_s13, 32, %s2294_s11, [#allocation16]   ;;  %v962_v50 = vshrl.u32 %v961_v49, 7 }
 0x5dd   : > { %s1105_s4 = scalar_lea.sflag [#allocation5], %s2126_s2  ;;  %s1785_s25 = scalar_lea.vmem %s2234_s27, 512 }
 0x5de   : > { %v963_v51 = vsub.s32 0, %v962_v50  ;;  %v967_v53 = vsub.s32 1, %v962_v50  ;;  %p1786_p5 = scmp.ne.s32.totalorder %s2234_s27, %s1785_s25  ;;  %p2334_p12 = scmp.ne.s32.totalorder %s2319_s24, 0 }
 0x5df   : > { %s1882_s13 = smov [#allocation14]  }
 0x5e0   : > { %v964_v54 = vrot.slane %v959_v52, %v963_v51  ;;  %v968_v55 = vrot.slane %v959_v52, %v967_v53  ;;  %p1787_p3 = pnand %p1786_p5, %p2334_p12  ;;  %s1789_s28 = sshll.u32 %s1882_s13, 4  ;;  %s1790_s28 = int_to_ptr.vmem [resolvable:$false] %s1789_s28 }
 0x5e1   : > { %s1791_s22 = scalar_lea.vmem %s1790_s28, 1024  ;;  %p1792_p1 = scmp.lt.s32.totalorder %s2234_s27, %s1790_s28 }
 0x5e2   : > { %p1788_p7 = pneg %p1787_p3  ;;  %p1793_p10 = scmp.lt.s32.totalorder %s1791_s22, %s1785_s25 }
 0x5e4   : > { %p1794_p8 = por %p1793_p10, %p1792_p1 }
 0x5e6   : > { %p1795_p2 = pnand %p1794_p8, %p1788_p7 }
 0x698   : > { %v1091_v56 = vpop.f32.mrf.mxu0 }
 0x699   : > { %v1092_v57 = vadd.f32 %v1091_v56, %v964_v54 }
 0x69a   : > { %v1093_v58 = vpop.f32.mrf.mxu0 }
 0x69b   : > { %1100 = vst [vmem:[%s2144_s29] sm:$0xff] %v1092_v57  ;;  %v1094_v59 = vadd.f32 %v1093_v58, %v968_v55 }
 0x69c   : > { %v1095_v60 = vpop.f32.mrf.mxu0 }
 0x69d   : > { %1101 = vst [vmem:[%s2144_s29 + $0x8] sm:$0xff] %v1094_v59  ;;  %v1096_v61 = vadd.f32 %v1095_v60, %v964_v54 }
 0x69e   : > { %v1097_v62 = vpop.f32.mrf.mxu0 }
 0x69f   : > { %1102 = vst [vmem:[%s2144_s29 + $0x10] sm:$0xff] %v1096_v61  ;;  %v1098_v63 = vadd.f32 %v1097_v62, %v968_v55 }
 0x6a1   : > { %1103 = vst [vmem:[%s2144_s29 + $0x18] sm:$0xff] %v1098_v63 }
 0x6a2   : > { %1798 = shalt.err (!%p1795_p2)
}
 0x6a3   : > { %s1799_s29 = scalar_lea.hbm %s2232_s30, 512  ;;  %s1803_s0 = scalar_lea.hbm %s2293_s10, 1024 }
 0x6a4   : > { %p1800_p0 = scmp.ne.s32.totalorder %s2232_s30, %s1799_s29  ;;  %p1804_p13 = scmp.lt.s32.totalorder %s2232_s30, %s2293_s10 }
 0x6a5   : > { %p1805_p4 = scmp.lt.s32.totalorder %s1803_s0, %s1799_s29 }
 0x6a6   : > { %p1801_p6 = pnand %p1800_p0, %p2334_p12 }
 0x6a7   : > { %p1806_p9 = por %p1805_p4, %p1804_p13 }
 0x6a8   : > { %p1802_p11 = pneg %p1801_p6 }
 0x6aa   : > { %p1807_p5 = pnand %p1806_p9, %p1802_p11 }
 0x6ac   : > { %1810 = shalt.err (!%p1807_p5)
}
 0x6ad   : > { %s1883_s14 = smov 256   ;;  %s1884_s25 = smov 512  }
 0x6ae   : > { %s1885_s13 = smov 16   ;;  %p2335_p3 = scmp.eq.s32.totalorder %s1967_s21, 1 }
 0x6af   : > { %1454 = dma.vmem_to_hbm [thread:$0]  (%p2334_p12), %s2234_s27, 512, %s2232_s30, %s1105_s4, %s1883_s14, %s1884_s25, %s1885_s13  }
 0x6b0   : > { %1844 = dma.done.wait (%p2335_p3), [#allocation16], 32   ;;  %p2336_p7 = pmov %p2335_p3 }
 0x6b2   : > { %1846 = vsyncadd (%p2336_p7), [#allocation16], 4294967264 }
 0x6b3 PF: > { %s2337_s28 = sld [smem:[#allocation23_spill]]  ;;  %s1148_s22 = sand.u32 1, %s1853_s17  }
 0x6b4   : > { %p2339_p10 = scmp.ge.s32.totalorder %s1865_s20, 2  ;;  %s1149_s29 = scalar_lea.sflag [#allocation5], %s1148_s22 }
 0x6b9   : > { %p2338_p1 = scmp.ne.s32.totalorder %s2337_s28, 0 }
 0x6bb   : > { %p1481_p8 = pnand %p2339_p10, %p2338_p1 }
 0x6bd   : > { %p1482_p2 = pneg %p1481_p8 }
 0x6bf   : > { %1848 = dma.done.wait (%p1482_p2), %s1149_s29, 512  }
 0x6c0   : > { %1850 = vsyncadd (%p1482_p2), %s1149_s29, 4294966784  ;;  %p29_p12 = scmp.ge.s32.totalorder %s2047_s12, 4   ;;  %s2340_s17 = smov %s1857_s18 }
 0x6c1   : > { %s2341_s18 = smov %s1861_s19  ;;  %s2342_s19 = smov %s2067_s16 }
 0x6c2   : > { %s2343_s20 = smov %s2047_s12  ;;  %31 = sbr.rel (!%p29_p12) target bundleno = 14 (0xe), region = 141 }
 0x6c7   :  { %1154 = vsyncpa [#allocation4], 1 }
 0x6c8   :  { %1156 = vsyncpa [#allocation4 + $0x1], 1 }
 0x6c9   :  { %1157 = vsyncpa [#allocation7], 1 }
 0x6ca   :  { %1158 = vsyncpa [#allocation10], 1 }
 0x6cb   :  { %1159 = vsyncpa [#allocation13], 1 }
 0x6cc   :  { %1161 = vsyncpa [#allocation13 + $0x1], 1 }
 0x6cd   :  { %1162 = vsyncpa [#allocation5], 1 }
 0x6ce   :  { %1164 = vsyncpa [#allocation5 + $0x1], 1 }
 0x6cf   :  { %1165 = vsyncpa [#allocation16], 1 }

</bundles_post_ra>
